<compile_context>
chip_gen: v7x
topology: tpu7x:2x2x1
jax: 0.10.0
libtpu: 0.0.40
codegen_flags: <defaults>
</compile_context>

<pallas_src>
import functools

import jax
import jax.numpy as jnp
from jax.experimental import pallas as pl
from jax.experimental.pallas import tpu as pltpu


# ----------------------------- Pallas kernels ------------------------------

def _chomp_copy_kernel(x_ref, o_ref):
    # Lane-aligned tiled path: the chomp is fully expressed by the output
    # grid extent, so the body is a pure block copy.
    o_ref[...] = x_ref[...]


def _chomp_slice_kernel(x_ref, o_ref, *, l_out):
    # Small / unaligned path: the input block carries the full L axis,
    # only the first l_out (chomped) columns are written out.
    o_ref[...] = x_ref[:, :l_out]


# ----------------------------- wrapper --------------------------------------

_LANE = 128
_SUBLANE = 8
_VMEM_BUDGET = 8 * 1024 * 1024  # bytes for double-buffered (in + out) tiles


def _pick_rows(rows_total, max_rows_by_budget):
    tr = max(_SUBLANE, max_rows_by_budget)
    tr = min(tr, rows_total)
    if tr < rows_total:
        tr = max(_SUBLANE, (tr // _SUBLANE) * _SUBLANE)  # keep sublane-aligned
    return tr


def chomp1d(x, chomp_size):
    """Pallas implementation of Chomp1d: x[:, :, :-chomp_size]."""
    B, C, L = x.shape
    assert 0 < chomp_size < L, "chomp_size must be in (0, L)"
    L_out = L - chomp_size

    R = B * C
    x2 = x.reshape(R, L)                      # free contiguous reshape
    itemsize = jnp.dtype(x.dtype).itemsize

    if L_out >= _LANE:
        # Lane-dense path: time tiles are multiples of 128 lanes; the final
        # partial tile (if any) is clipped by Pallas (OOB stores dropped).
        TL = min(2048, (L_out // _LANE) * _LANE)
        tr = _pick_rows(R, _VMEM_BUDGET // (4 * TL * itemsize))
        grid = (pl.cdiv(R, tr), pl.cdiv(L_out, TL))
        out = pl.pallas_call(
            _chomp_copy_kernel,
            out_shape=jax.ShapeDtypeStruct((R, L_out), x.dtype),
            grid=grid,
            in_specs=[pl.BlockSpec((tr, TL), lambda i, j: (i, j))],
            out_specs=pl.BlockSpec((tr, TL), lambda i, j: (i, j)),
            compiler_params=pltpu.CompilerParams(
                dimension_semantics=("parallel", "parallel")),
        )(x2)
    else:
        # Short sequences: full-extent blocks along time on both sides.
        tr = _pick_rows(R, _VMEM_BUDGET // (2 * (L + L_out) * itemsize))
        grid = (pl.cdiv(R, tr),)
        out = pl.pallas_call(
            functools.partial(_chomp_slice_kernel, l_out=L_out),
            out_shape=jax.ShapeDtypeStruct((R, L_out), x.dtype),
            grid=grid,
            in_specs=[pl.BlockSpec((tr, L), lambda i: (i, 0))],
            out_specs=pl.BlockSpec((tr, L_out), lambda i: (i, 0)),
            compiler_params=pltpu.CompilerParams(
                dimension_semantics=("parallel",)),
        )(x2)

    return out.reshape(B, C, L_out)


# --------------------------------- main --------------------------------------

if __name__ == "__main__":
    key = jax.random.PRNGKey(0)
    k1, k2 = jax.random.split(key)

    # Case 1: small shapes consistent with the module (short/unaligned path).
    B, C, L, chomp = 2, 4, 16, 3
    x = jax.random.normal(k1, (B, C, L), jnp.float32)
    y = jax.block_until_ready(chomp1d(x, chomp))
    ref = x[:, :, :L - chomp]
    assert y.shape == (B, C, L - chomp) and y.dtype == x.dtype
    assert bool(jnp.array_equal(y, ref))

    # Case 2: longer sequence to exercise the lane-aligned tiled path.
    B2, C2, L2, chomp2 = 2, 8, 640, 13
    x2 = jax.random.normal(k2, (B2, C2, L2), jnp.float32)
    y2 = jax.block_until_ready(chomp1d(x2, chomp2))
    ref2 = x2[:, :, :L2 - chomp2]
    assert y2.shape == (B2, C2, L2 - chomp2)
    assert bool(jnp.array_equal(y2, ref2))

    print("KERNEL_OK")
</pallas_src>

<mosaic_0001>
module attributes {stable_mosaic.version = 11 : i64} {
  func.func @_chomp_slice_kernel(%arg0: i32, %arg1: memref<8x16xf32, #tpu.memory_space<vmem>>, %arg2: memref<8x13xf32, #tpu.memory_space<vmem>>) attributes {dimension_semantics = [#tpu.dimension_semantics<parallel>], iteration_bounds = array<i64: 1>, scalar_prefetch = 0 : i64, scratch_operands = 0 : i64, tpu.core_type = #tpu.core_type<tc>, window_params = [{transform_indices = @transform_0, window_bounds = array<i64: 8, 16>}, {transform_indices = @transform_1, window_bounds = array<i64: 8, 13>}]} {
    %c0 = arith.constant 0 : index
    %c0_0 = arith.constant 0 : index
    %0 = vector.load %arg1[%c0, %c0_0] : memref<8x16xf32, #tpu.memory_space<vmem>>, vector<8x13xf32>
    %c0_1 = arith.constant 0 : index
    %c0_2 = arith.constant 0 : index
    %1 = vector.load %arg2[%c0_1, %c0_2] : memref<8x13xf32, #tpu.memory_space<vmem>>, vector<8x13xf32>
    tpu.vector_store %arg2[%c0_1, %c0_2], %0 {strides = array<i32>} : memref<8x13xf32, #tpu.memory_space<vmem>>, vector<8x13xf32>,
    return
  }
  func.func @transform_0(%arg0: i32) -> (i32, i32) {
    %c0_i32 = arith.constant 0 : i32
    %c0_i32_0 = arith.constant 0 : i32
    return %arg0, %c0_i32 : i32, i32
  }
  func.func @transform_1(%arg0: i32) -> (i32, i32) {
    %c0_i32 = arith.constant 0 : i32
    %c0_i32_0 = arith.constant 0 : i32
    return %arg0, %c0_i32 : i32, i32
  }
}

</mosaic_0001>

<bundles_post_ra>
// kernel: tpu_custom_call.1
= control target key start
LH: loop header
LB: loop body
LE: loop exit
PB: predicated region body
PF: predicated region fallthrough
CT: control target
= control target key end

     0   :  { %6 = vsyncpa [#allocation3], 0  ;;  %s125_s0 = inlined_call_operand.hbm [shape: f32[8,16], index: 0, kind: input, shape index: {}]   ;;  %s126_s1 = inlined_call_operand.hbm [shape: f32[8,13], index: 1, kind: output, shape index: {}]  }
   0x1   :  { %7 = vsyncpa [#allocation4], 0  ;;  %s89_s6 = smov [#allocation2]   ;;  %s41_s10 = scalar_lea.hbm %s125_s0, 128 }
   0x2   :  { %s14_s7 = sshll.u32 %s89_s6, 4  ;;  %p42_p0 = scmp.ne.s32.totalorder %s125_s0, %s41_s10  ;;  %s15_s7 = int_to_ptr.vmem [resolvable:$true] %s14_s7 }
   0x3   :  { %p45_p1 = scmp.lt.u32.totalorder %s41_s10, %s125_s0 }
   0x5   :  { %p47_p2 = pnand %p45_p1, %p42_p0 }
   0x7   :  { %50 = shalt.err (!%p47_p2)
}
   0x8   :  { %s51_s15 = scalar_lea.vmem %s15_s7, 128  ;;  %p56_p4 = scmp.lt.s32.totalorder %s15_s7, %s15_s7 }
   0x9   :  { %p52_p3 = scmp.ne.s32.totalorder %s15_s7, %s51_s15  ;;  %p57_p5 = scmp.lt.s32.totalorder %s51_s15, %s51_s15 }
   0xb   :  { %p58_p6 = por %p57_p5, %p56_p4 }
   0xd   :  { %p59_p7 = pnand %p58_p6, %p52_p3 }
   0xf   :  { %62 = shalt.err (!%p59_p7)
}
  0x10   :  { %17 = dma.hbm_to_vmem [thread:$0]  %s125_s0, 128, %s15_s7, [#allocation3]  }
  0x11   :  { %85 = dma.done.wait [#allocation3], 128  }
  0x12   :  { %86 = vsyncadd [#allocation3], 4294967168  ;;  %s90_s18 = smov [#allocation5]   ;;  %vm22_vm0 = vcmask 105472   ;;  %v21_v0 = vld [vmem:[#allocation2] sm:$0xff] }
  0x13   :  { %s30_s19 = sshll.u32 %s90_s18, 4  ;;  %23 = vst.msk [vmem:[#allocation5] sm:$0xff] %vm22_vm0, %v21_v0  ;;  %s31_s19 = int_to_ptr.vmem [resolvable:$true] %s30_s19 }
  0x14   :  { %s63_s20 = scalar_lea.vmem %s31_s19, 128  ;;  %p68_p9 = scmp.lt.s32.totalorder %s31_s19, %s31_s19 }
  0x15   :  { %p64_p8 = scmp.ne.s32.totalorder %s31_s19, %s63_s20  ;;  %p69_p10 = scmp.lt.s32.totalorder %s63_s20, %s63_s20 }
  0x17   :  { %p70_p11 = por %p69_p10, %p68_p9 }
  0x19   :  { %p71_p12 = pnand %p70_p11, %p64_p8 }
  0x1b   :  { %74 = shalt.err (!%p71_p12)
}
  0x1c   :  { %s75_s23 = scalar_lea.hbm %s126_s1, 128 }
  0x1d   :  { %p76_p13 = scmp.ne.s32.totalorder %s126_s1, %s75_s23  ;;  %p79_p0 = scmp.lt.u32.totalorder %s75_s23, %s126_s1 }
  0x1f   :  { %p81_p1 = pnand %p79_p0, %p76_p13 }
  0x21   :  { %84 = shalt.err (!%p81_p1)
}
  0x22   :  { %33 = dma.vmem_to_hbm [thread:$0]  %s31_s19, 128, %s126_s1, [#allocation4]  }
  0x23   :  { %87 = dma.done.wait [#allocation4], 128  }
  0x24   :  { %88 = vsyncadd [#allocation4], 4294967168 }
  0x25   :  { %37 = vsyncpa [#allocation3], 1 }
  0x26   :  { %38 = vsyncpa [#allocation4], 1 }

</bundles_post_ra>
